<compile_context>
chip_gen: v5e
topology: v5e:2x2
jax: 0.10.0
libtpu: 0.0.40
codegen_flags: <defaults>
</compile_context>

<pallas_src>
import functools

import jax
import jax.numpy as jnp
from jax import lax
from jax.experimental import pallas as pl
from jax.experimental.pallas import tpu as pltpu


_EPS = 1e-12            # F.normalize clamps the *norm* at eps ...
_EPS_SQ = _EPS * _EPS   # ... so clamp the sum-of-squares at eps**2.


def _round_up(v: int, m: int) -> int:
    return (v + m - 1) // m * m


def _normed_linear_kernel(x_ref, w_ref, cinv_ref, o_ref, *,
                          temperature: float, matmul_dtype):
    """out = temperature * rsqrt(rowss(x)) * (x @ W) * col_inv."""
    x = x_ref[...]                                            # (TR, D), input dtype
    x32 = x.astype(jnp.float32)
    # Row inverse norms: VPU square+sum, rsqrt on the EUP (otherwise idle slot);
    # temperature folded in so the epilogue is a single fused scaling.
    row_scale = temperature * lax.rsqrt(
        jnp.maximum(jnp.sum(x32 * x32, axis=1, keepdims=True), _EPS_SQ))   # (TR, 1)

    x_mm = x if matmul_dtype is None else x.astype(matmul_dtype)
    acc = jnp.dot(x_mm, w_ref[...], preferred_element_type=jnp.float32)    # (TR, TC)
    o_ref[...] = (acc * row_scale * cinv_ref[...]).astype(o_ref.dtype)


def _tpu_info():
    """Returns (vmem_capacity_bytes, lane_rounding, tensorcores_per_chip)."""
    kind = ""
    try:
        kind = jax.devices()[0].device_kind.lower()
    except Exception:
        pass
    try:
        vmem_cap = int(pltpu.get_tpu_info().vmem_capacity_bytes)
    except Exception:
        vmem_cap = (64 << 20) if "v7" in kind else (128 << 20)
    # MXU is 128 wide on <= v5, 256 wide on v6e/v7x.
    lane_round = 128 if any(f"v{g}" in kind for g in (2, 3, 4, 5)) else 256
    n_cores = 2 if "v7" in kind else 1
    return vmem_cap, lane_round, n_cores


def vanilla_stellar_classification_head(x: jax.Array, weight: jax.Array,
                                        temperature: float, *,
                                        block_rows: int | None = None,
                                        block_cols: int | None = None,
                                        matmul_dtype=None) -> jax.Array:
    """Pallas TPU implementation of VanillaStellarClassifficationHead.forward."""
    n, d = x.shape
    d_w, c = weight.shape
    assert d == d_w, f"feature dim mismatch: {d} vs {d_w}"
    out_dtype = x.dtype

    vmem_cap, lane_round, n_cores = _tpu_info()

    # ---- class (lane) dimension: pad W's columns so output stores are lane-dense
    # and the MXU column dimension is filled (256 on v6e/v7x, 128 on v5e).
    c_pad = _round_up(c, lane_round)

    w_mm_dtype = weight.dtype if matmul_dtype is None else jnp.dtype(matmul_dtype)
    w_p = weight.astype(w_mm_dtype)
    if c_pad != c:
        w_p = jnp.pad(w_p, ((0, 0), (0, c_pad - c)))

    # Hoisted per-class inverse column norms (computed ONCE, f32, ~KB sized).
    w32 = weight.astype(jnp.float32)
    col_inv = lax.rsqrt(jnp.maximum(jnp.sum(w32 * w32, axis=0, keepdims=True),
                                    _EPS_SQ))                           # (1, C)
    if c_pad != c:
        col_inv = jnp.pad(col_inv, ((0, 0), (0, c_pad - c)))            # pad lanes -> 0

    x_isz = x.dtype.itemsize
    w_isz = w_p.dtype.itemsize
    o_isz = jnp.dtype(out_dtype).itemsize

    # ---- column tiling: keep W VMEM-resident when it comfortably fits,
    # otherwise tile the class dimension (large heads on v7x's 64 MiB VMEM).
    if block_cols is None:
        if d * c_pad * w_isz <= vmem_cap // 3:
            block_cols = c_pad
        else:
            bc = (vmem_cap // 3) // (2 * d * w_isz)
            bc = max(lane_round, (bc // lane_round) * lane_round)
            block_cols = min(bc, 2048, c_pad)
    block_cols = min(max(_round_up(block_cols, 128), 128), c_pad)

    # ---- row tiling: big tiles amortize per-step overhead; on v7x guarantee >= 2
    # batch tiles so the "parallel" axis can be sharded across both TensorCores.
    if block_rows is None:
        block_rows = 512 if vmem_cap <= (96 << 20) else 1024
        if n_cores > 1 and n > 8:
            block_rows = min(block_rows, _round_up(-(-n // 2), 8))
    block_rows = max(8, _round_up(min(block_rows, _round_up(n, 8)), 8))

    # ---- VMEM budget (includes in-kernel f32 temporaries), clamped below the
    # physical capacity of the current generation.
    def _need(br, bc):
        bufs_w = 1 if bc >= c_pad else 2
        x_t = 2 * br * d * x_isz                     # double-buffered x tiles
        w_t = bufs_w * d * bc * w_isz                # resident (single) or streamed W
        ci_t = bufs_w * bc * 4                       # col_inv
        o_t = 2 * br * bc * o_isz                    # double-buffered out tiles
        temps = br * bc * 4 + br * d * 4 + br * 4 + bc * 4   # acc, x32, row_scale
        return x_t + w_t + ci_t + o_t + temps + (2 << 20)

    budget = int(vmem_cap * 0.85)
    while _need(block_rows, block_cols) > budget:
        if block_rows > 64:
            block_rows = _round_up(block_rows // 2, 8)
        elif block_cols > lane_round:
            block_cols = _round_up(block_cols // 2, lane_round)
        elif block_rows > 8:
            block_rows = _round_up(block_rows // 2, 8)
        else:
            break
    vmem_limit = int(min(_need(block_rows, block_cols), vmem_cap * 9 // 10))

    num_col_tiles = -(-c_pad // block_cols)
    num_row_tiles = -(-n // block_rows)
    w_resident = num_col_tiles == 1

    # W block never changes within a column tile -> single-buffer it when resident.
    w_spec_kwargs = {"pipeline_mode": pl.Buffered(1)} if w_resident else {}

    in_specs = [
        pl.BlockSpec((block_rows, d), lambda j, i: (i, 0)),                   # x rows
        pl.BlockSpec((d, block_cols), lambda j, i: (0, j), **w_spec_kwargs),  # W
        pl.BlockSpec((1, block_cols), lambda j, i: (0, j)),                   # col_inv
    ]
    out_specs = pl.BlockSpec((block_rows, block_cols), lambda j, i: (i, j))

    cost = pl.CostEstimate(
        flops=2 * n * d * c_pad,
        transcendentals=n * num_col_tiles + c_pad,
        bytes_accessed=(n * d * x_isz) * num_col_tiles
        + d * c_pad * w_isz + c_pad * 4 + n * c_pad * o_isz,
    )

    kernel = functools.partial(
        _normed_linear_kernel,
        temperature=float(temperature),
        matmul_dtype=None if matmul_dtype is None else jnp.dtype(matmul_dtype),
    )

    out = pl.pallas_call(
        kernel,
        out_shape=jax.ShapeDtypeStruct((n, c_pad), out_dtype),
        grid_spec=pltpu.PrefetchScalarGridSpec(
            num_scalar_prefetch=0,
            grid=(num_col_tiles, num_row_tiles),
            in_specs=in_specs,
            out_specs=out_specs,
        ),
        compiler_params=pltpu.CompilerParams(
            dimension_semantics=("parallel", "parallel"),
            vmem_limit_bytes=vmem_limit,
        ),
        cost_estimate=cost,
    )(x, w_p, col_inv)

    # TODO(synk): the trailing column slice (only when num_classes % lane_round != 0)
    # is an XLA-side copy; could be fused into the consumer instead.
    return out if c_pad == c else out[:, :c]


def init_normed_linear_weight(key: jax.Array, in_features: int,
                              out_features: int) -> jax.Array:
    """`uniform_(-1,1).renorm_(2, 1, 1e-5).mul_(1e5)` on a (in, out) tensor:
    renorm_ dim=1 renormalizes each column weight[:, j] -> norms over axis=0."""
    w = jax.random.uniform(key, (in_features, out_features),
                           minval=-1.0, maxval=1.0, dtype=jnp.float32)
    maxnorm = 1e-5
    col_norm = jnp.sqrt(jnp.sum(w * w, axis=0, keepdims=True))
    scale = jnp.where(col_norm > maxnorm, maxnorm / (col_norm + 1e-7), 1.0)
    return w * scale * 1e5


def _reference(x, w, temperature):
    eps = 1e-12
    xn = x / jnp.maximum(jnp.linalg.norm(x, axis=1, keepdims=True), eps)
    wn = w / jnp.maximum(jnp.linalg.norm(w, axis=0, keepdims=True), eps)
    return temperature * (xn @ wn)


if __name__ == "__main__":
    key = jax.random.PRNGKey(0)
    k_x, k_w, k_x2, k_w2 = jax.random.split(key, 4)

    # Shapes consistent with the module: (batch, input_dim) -> (batch, num_classes).
    batch, input_dim, num_classes, temperature = 8, 32, 8, 10.0
    x = jax.random.normal(k_x, (batch, input_dim), dtype=jnp.float32)
    weight = init_normed_linear_weight(k_w, input_dim, num_classes)

    out = jax.block_until_ready(
        vanilla_stellar_classification_head(x, weight, temperature))
    ref = _reference(x, weight, temperature)
    assert out.shape == (batch, num_classes)
    assert jnp.allclose(out, ref, atol=2e-4, rtol=2e-4), "mismatch vs reference (small)"

    # Second case: non-multiple-of-8/lane shapes and a multi-tile batch grid
    # (ragged last tile handled by masked stores, no x padding).
    b2, d2, c2 = 200, 32, 10
    x2 = jax.random.normal(k_x2, (b2, d2), dtype=jnp.float32)
    w2 = init_normed_linear_weight(k_w2, d2, c2)
    out2 = jax.block_until_ready(
        vanilla_stellar_classification_head(x2, w2, temperature, block_rows=64))
    ref2 = _reference(x2, w2, temperature)
    assert out2.shape == (b2, c2)
    assert jnp.allclose(out2, ref2, atol=2e-4, rtol=2e-4), "mismatch vs reference (tiled)"

    print("KERNEL_OK")
</pallas_src>

<mosaic_0001>
module attributes {stable_mosaic.version = 11 : i64} {
  func.func @_normed_linear_kernel(%arg0: i32, %arg1: i32, %arg2: memref<8x32xf32, #tpu.memory_space<vmem>>, %arg3: memref<32x256xf32, #tpu.memory_space<vmem>>, %arg4: memref<1x256xf32, #tpu.memory_space<vmem>>, %arg5: memref<8x256xf32, #tpu.memory_space<vmem>>) attributes {dimension_semantics = [#tpu.dimension_semantics<parallel>, #tpu.dimension_semantics<parallel>], iteration_bounds = array<i64: 1, 1>, scalar_prefetch = 0 : i64, scratch_operands = 0 : i64, tpu.core_type = #tpu.core_type<tc>, window_params = [{transform_indices = @transform_0, window_bounds = array<i64: 8, 32>}, {pipeline_mode = #tpu.pipeline_mode<synchronous>, transform_indices = @transform_1, window_bounds = array<i64: 32, 256>}, {transform_indices = @transform_2, window_bounds = array<i64: 1, 256>}, {transform_indices = @transform_3, window_bounds = array<i64: 8, 256>}]} {
    %c0 = arith.constant 0 : index
    %c0_0 = arith.constant 0 : index
    %0 = vector.load %arg2[%c0, %c0_0] : memref<8x32xf32, #tpu.memory_space<vmem>>, vector<8x32xf32>
    %1 = arith.mulf %0, %0 : vector<8x32xf32>
    %cst = arith.constant dense<0.000000e+00> : vector<8xf32>
    %2 = vector.multi_reduction <add>, %1, %cst [1] : vector<8x32xf32> to vector<8xf32>
    %3 = vector.shape_cast %2 : vector<8xf32> to vector<8x1xf32>
    %cst_1 = arith.constant 1.000000e-24 : f32
    %4 = vector.broadcast %cst_1 : f32 to vector<8x1xf32>
    %5 = arith.maximumf %3, %4 : vector<8x1xf32>
    %6 = math.rsqrt %5 : vector<8x1xf32>
    %cst_2 = arith.constant 1.000000e+01 : f32
    %7 = vector.broadcast %cst_2 : f32 to vector<8x1xf32>
    %8 = arith.mulf %7, %6 : vector<8x1xf32>
    %c0_3 = arith.constant 0 : index
    %c0_4 = arith.constant 0 : index
    %9 = vector.load %arg3[%c0_3, %c0_4] : memref<32x256xf32, #tpu.memory_space<vmem>>, vector<32x256xf32>
    %cst_5 = arith.constant dense<0.000000e+00> : vector<8x256xf32>
    %10 = tpu.matmul %0, %9, %cst_5 {dimension_numbers = #tpu.dot_dimension_numbers<[1], [0], [0], [1], [0, 0, 1, 1], [], []>} : vector<8x32xf32>, vector<32x256xf32>, vector<8x256xf32> -> vector<8x256xf32>
    %11 = vector.broadcast %8 : vector<8x1xf32> to vector<8x256xf32>
    %12 = arith.mulf %10, %11 : vector<8x256xf32>
    %c0_6 = arith.constant 0 : index
    %c0_7 = arith.constant 0 : index
    %13 = vector.load %arg4[%c0_6, %c0_7] : memref<1x256xf32, #tpu.memory_space<vmem>>, vector<1x256xf32>
    %14 = vector.broadcast %13 : vector<1x256xf32> to vector<8x256xf32>
    %15 = arith.mulf %12, %14 : vector<8x256xf32>
    %c0_8 = arith.constant 0 : index
    %c0_9 = arith.constant 0 : index
    %16 = vector.load %arg5[%c0_8, %c0_9] : memref<8x256xf32, #tpu.memory_space<vmem>>, vector<8x256xf32>
    tpu.vector_store %arg5[%c0_8, %c0_9], %15 {strides = array<i32>} : memref<8x256xf32, #tpu.memory_space<vmem>>, vector<8x256xf32>,
    return
  }
  func.func @transform_0(%arg0: i32, %arg1: i32) -> (i32, i32) {
    %c0_i32 = arith.constant 0 : i32
    %c0_i32_0 = arith.constant 0 : i32
    return %arg1, %c0_i32 : i32, i32
  }
  func.func @transform_1(%arg0: i32, %arg1: i32) -> (i32, i32) {
    %c0_i32 = arith.constant 0 : i32
    %c0_i32_0 = arith.constant 0 : i32
    return %c0_i32, %arg0 : i32, i32
  }
  func.func @transform_2(%arg0: i32, %arg1: i32) -> (i32, i32) {
    %c0_i32 = arith.constant 0 : i32
    %c0_i32_0 = arith.constant 0 : i32
    return %c0_i32, %arg0 : i32, i32
  }
  func.func @transform_3(%arg0: i32, %arg1: i32) -> (i32, i32) {
    %c0_i32 = arith.constant 0 : i32
    return %arg1, %arg0 : i32, i32
  }
}

</mosaic_0001>

<bundles_post_ra>
// kernel: tpu_custom_call.1
= control target key start
LH: loop header
LB: loop body
LE: loop exit
PB: predicated region body
PF: predicated region fallthrough
CT: control target
= control target key end

     0   :  { %8 = vsyncpa [#allocation3], 0  ;;  %s310_s0 = inlined_call_operand.hbm [shape: f32[8,32], index: 0, kind: input, shape index: {}]   ;;  %s311_s1 = inlined_call_operand.hbm [shape: f32[32,256], index: 1, kind: input, shape index: {}]   ;;  %s312_s2 = inlined_call_operand.hbm [shape: f32[1,256], index: 2, kind: input, shape index: {}]   ;;  %s313_s3 = inlined_call_operand.hbm [shape: f32[8,256], index: 3, kind: output, shape index: {}]  }
   0x1   :  { %9 = vsyncpa [#allocation6], 0  ;;  %s26_s14 = sshll.u32 %s311_s1, 4  ;;  %s27_s14 = int_to_ptr.hbm [resolvable:$true] %s26_s14 }
   0x2   :  { %10 = vsyncpa [#allocation4], 0  ;;  %s269_s15 = smov [#allocation5]   ;;  %s16_s19 = sshll.u32 %s310_s0, 4  ;;  %s17_s19 = int_to_ptr.hbm [resolvable:$true] %s16_s19 }
   0x3   :  { %s28_s16 = sshll.u32 %s269_s15, 4  ;;  %s270_s20 = smov 256   ;;  %s29_s16 = int_to_ptr.vmem [resolvable:$true] %s28_s16 }
   0x4   :  { %s271_s21 = smov 16   ;;  %s272_s22 = smov [#allocation2]  }
   0x5   :  { %34 = dma.hbm_to_vmem [thread:$0]  %s27_s14, 1024, %s29_s16, [#allocation6], %s270_s20, %s270_s20, %s271_s21  }
   0x6   :  { %s18_s23 = sshll.u32 %s272_s22, 4  ;;  %s40_s26 = sshll.u32 %s312_s2, 4  ;;  %s19_s23 = int_to_ptr.vmem [resolvable:$true] %s18_s23  ;;  %s41_s26 = int_to_ptr.hbm [resolvable:$true] %s40_s26 }
   0x7   :  { %21 = dma.hbm_to_vmem [thread:$0]  %s17_s19, 128, %s19_s23, [#allocation3]  }
   0x8   :  { %s273_s1 = smov [#allocation7]  }
   0x9   :  { %s42_s27 = sshll.u32 %s273_s1, 4  ;;  %s43_s27 = int_to_ptr.vmem [resolvable:$true] %s42_s27 }
   0xa   :  { %45 = dma.hbm_to_vmem [thread:$0]  %s41_s26, 32, %s43_s27, [#allocation6]  }
   0xb   :  { %263 = dma.done.wait [#allocation3], 128  }
   0xc   :  { %264 = vsyncadd [#allocation3], 4294967168 }
   0xd   :  { %265 = dma.done.wait [#allocation6], 1056  }
   0xe   :  { %266 = vsyncadd [#allocation6], 4294966240  ;;  %v58_v0 = vld [vmem:[#allocation2] sm:$0xff]  ;;  %vm60_vm0 = vcmask 261120   ;;  %v82_v1 = vld [vmem:[#allocation5 + $0x30] sm:$0xff]  ;;  %s274_s0 = smov [#allocation8]  }
   0xf   :  { %v83_v2 = vld [vmem:[#allocation5 + $0x38] sm:$0xff]  ;;  %v59_v3 = vmul.f32 %v58_v0, %v58_v0  ;;  %99 = vmatpush.msra.mxu0 %v82_v1  ;;  %v80_v4 = vld [vmem:[#allocation5 + $0x20] sm:$0xff]  ;;  %v81_v5 = vld [vmem:[#allocation5 + $0x28] sm:$0xff]  ;;  %s144_s2 = sshll.u32 %s274_s0, 4  ;;  %s146_s30 = sshll.u32 %s313_s3, 4  ;;  %s145_s2 = int_to_ptr.vmem [resolvable:$true] %s144_s2  ;;  %s147_s30 = int_to_ptr.hbm [resolvable:$true] %s146_s30 }
  0x10   :  { %119 = vmatpush.msra.mxu1 %v83_v2  ;;  %v78_v6 = vld [vmem:[#allocation5 + $0x10] sm:$0xff]  ;;  %v79_v7 = vld [vmem:[#allocation5 + $0x18] sm:$0xff]  ;;  %v76_v9 = vld [vmem:[#allocation5] sm:$0xff] }
  0x11   :  { %v61_v8 = vsel %vm60_vm0, %v59_v3, 0.0  ;;  %100 = vmatpush.msra.mxu0 %v80_v4  ;;  %v77_v10 = vld [vmem:[#allocation5 + $0x8] sm:$0xff]  ;;  %v129_v19 = vld [vmem:[#allocation7] sm:$0x3] }
  0x12   :  { %120 = vmatpush.msra.mxu1 %v81_v5  ;;  %62 = vadd.xlane.f32.xlu0 %v61_v8  ;;  %v131_v24 = vperm.slane %v129_v19, 0  ;;  %v132_v25 = vperm.slane %v129_v19, 1 }
  0x13   :  { %101 = vmatpush.msra.mxu0 %v78_v6 }
  0x14   :  { %121 = vmatpush.msra.mxu1 %v79_v7 }
  0x15   :  { %102 = vmatpush.msra.mxu0 %v76_v9 }
  0x16   :  { %122 = vmatpush.msra.mxu1 %v77_v10  ;;  %157 = vmatmul.msk.f32.vlgmr.msra.gmra.mxu0 %vm60_vm0, %v58_v0 }
  0x17   :  { %158 = vmatmul.msk.f32.vlgmr.msra.gmra.mxu1 %vm60_vm0, %v58_v0 }
  0x85   :  { %v63_v11 = vpop.xlane.xlu0 %62 }
  0x86   :  { %v64_v12 = vmax.f32 %v63_v11, 1e-24 }
  0x88   :  { %165 = vrsqrt.f32 %v64_v12  ;;  %vm71_vm2 = vweird.f32 %v64_v12 }
  0x8e   :  { %v166_v13 = vpop.eup %165 }
  0x8f   :  { %v66_v14 = vmul.f32 %v166_v13, %v64_v12  ;;  %vm72_vm1 = vweird.f32 %v166_v13 }
  0x90   :  { %vm73_vm3 = vmor %vm71_vm2, %vm72_vm1 }
  0x91   :  { %v67_v15 = vmul.f32 %v166_v13, %v66_v14 }
  0x93   :  { %v68_v16 = vmul.f32 0.5, %v67_v15  ;;  %v104_v21 = vpop.f32.mrf.mxu0 }
  0x94   :  { %v124_v22 = vpop.f32.mrf.mxu1 }
  0x95   :  { %v69_v17 = vsub.f32 1.5, %v68_v16 }
  0x97   :  { %v70_v18 = vmul.f32 %v166_v13, %v69_v17 }
  0x99   :  { %v74_v20 = vsel %vm73_vm3, %v166_v13, %v70_v18 }
  0x9a   :  { %v75_v23 = vmul.f32 10.0, %v74_v20 }
  0x9c   :  { %v127_v26 = vmul.f32 %v104_v21, %v75_v23  ;;  %v128_v27 = vmul.f32 %v124_v22, %v75_v23 }
  0x9e   :  { %v135_v28 = vmul.f32 %v131_v24, %v127_v26  ;;  %v136_v29 = vmul.f32 %v132_v25, %v128_v27 }
  0xa0   :  { %137 = vst [vmem:[#allocation8] sm:$0xff] %v135_v28 }
  0xa1   :  { %138 = vst [vmem:[#allocation8 + $0x8] sm:$0xff] %v136_v29 }
  0xa2   :  { %149 = dma.vmem_to_hbm [thread:$0]  %s145_s2, 256, %s147_s30, [#allocation4]  }
  0xa3   :  { %267 = dma.done.wait [#allocation4], 256  }
  0xa4   :  { %268 = vsyncadd [#allocation4], 4294967040 }
  0xa5   :  { %154 = vsyncpa [#allocation3], 1 }
  0xa6   :  { %155 = vsyncpa [#allocation6], 1 }
  0xa7   :  { %156 = vsyncpa [#allocation4], 1 }

</bundles_post_ra>
